<compile_context>
chip_gen: v5e
topology: v5e:2x2
jax: 0.10.0
libtpu: 0.0.40
codegen_flags: <defaults>
</compile_context>

<pallas_src>
import functools
import math

import jax
import jax.numpy as jnp
from jax.experimental import pallas as pl
from jax.experimental.pallas import tpu as pltpu


def _round_up(a: int, b: int) -> int:
    return -(-a // b) * b


def _normlinear_kernel(x_ref, w_ref, o_ref, acc_ref, nrm_ref):
    """Computes one (tm, tn) tile of x @ normalize(W, axis=0)."""
    k = pl.program_id(2)

    @pl.when(k == 0)
    def _init():
        acc_ref[...] = jnp.zeros_like(acc_ref)
        nrm_ref[...] = jnp.zeros_like(nrm_ref)

    # Weight tile stays in its native dtype for the MXU; the f32 cast is only
    # for the column sum-of-squares reduction (accumulated along the K axis).
    w = w_ref[...]
    wf = w.astype(jnp.float32)
    nrm_ref[...] += jnp.sum(wf * wf, axis=0, keepdims=True)

    acc_ref[...] += jnp.dot(x_ref[...], w, preferred_element_type=jnp.float32)

    @pl.when(k == pl.num_programs(2) - 1)
    def _finalize():
        # F.normalize(dim=0): w / max(||w||, 1e-12)
        #   == scale output column by rsqrt(max(||w||^2, 1e-24)).
        inv = jax.lax.rsqrt(jnp.maximum(nrm_ref[...], 1e-24))
        o_ref[...] = (acc_ref[...] * inv).astype(o_ref.dtype)


@functools.partial(jax.jit, static_argnames=("tm", "tn", "tk"))
def norm_linear(x, weight, *, tm=256, tn=256, tk=512):
    """x: (..., in_dim), weight: (in_dim, out_dim) -> (..., out_dim)."""
    in_dim, out_dim = weight.shape
    assert x.shape[-1] == in_dim, (x.shape, weight.shape)
    lead_shape = x.shape[:-1]
    m = int(math.prod(lead_shape)) if lead_shape else 1
    x2d = x.reshape(m, in_dim)
    out_dtype = jnp.result_type(x.dtype, weight.dtype)

    # Clamp tiles to the (alignment-rounded) problem size; keep TPU-friendly
    # (8, 128) multiples so every block is lane-dense and unmasked.
    tm = min(tm, _round_up(m, 8))
    tk = min(tk, _round_up(in_dim, 128))
    tn = min(tn, _round_up(out_dim, 128))

    m_p = _round_up(m, tm)
    k_p = _round_up(in_dim, tk)
    n_p = _round_up(out_dim, tn)

    if (m_p, k_p) != (m, in_dim):
        x2d = jnp.pad(x2d, ((0, m_p - m), (0, k_p - in_dim)))
    w_p = weight
    if (k_p, n_p) != (in_dim, out_dim):
        w_p = jnp.pad(weight, ((0, k_p - in_dim), (0, n_p - out_dim)))

    grid = (m_p // tm, n_p // tn, k_p // tk)

    # VMEM budget: double-buffered inputs + output, f32 accumulator + norm.
    in_b = x2d.dtype.itemsize
    w_b = w_p.dtype.itemsize
    o_b = jnp.dtype(out_dtype).itemsize
    vmem_est = (2 * tm * tk * in_b + 2 * tk * tn * w_b + 2 * tm * tn * o_b
                + tm * tn * 4 + 8 * tn * 4)
    vmem_limit = int(min(max(2 * vmem_est, 32 << 20), 48 << 20))

    cost = pl.CostEstimate(
        flops=2 * m_p * k_p * n_p,
        transcendentals=n_p,
        bytes_accessed=(x2d.size * in_b + w_p.size * w_b + m_p * n_p * o_b),
    )

    out2d = pl.pallas_call(
        _normlinear_kernel,
        out_shape=jax.ShapeDtypeStruct((m_p, n_p), out_dtype),
        grid_spec=pltpu.PrefetchScalarGridSpec(
            num_scalar_prefetch=0,
            grid=grid,
            in_specs=[
                pl.BlockSpec((tm, tk), lambda i, j, k: (i, k)),
                pl.BlockSpec((tk, tn), lambda i, j, k: (k, j)),
            ],
            out_specs=pl.BlockSpec((tm, tn), lambda i, j, k: (i, j)),
            scratch_shapes=[
                pltpu.VMEM((tm, tn), jnp.float32),   # matmul accumulator
                pltpu.VMEM((1, tn), jnp.float32),    # column sum-of-squares
            ],
        ),
        compiler_params=pltpu.CompilerParams(
            dimension_semantics=("parallel", "parallel", "arbitrary"),
            vmem_limit_bytes=vmem_limit,
        ),
        cost_estimate=cost,
    )(x2d, w_p)

    return out2d[:m, :out_dim].reshape(*lead_shape, out_dim)


def init_norm_linear_weight(key, in_dim, out_dim, dtype=jnp.float32):
    # nn.init.xavier_uniform_(W, gain=calculate_gain('relu')):
    #   gain = sqrt(2); bound = gain * sqrt(6 / (fan_in + fan_out)).
    gain = math.sqrt(2.0)
    bound = gain * math.sqrt(6.0 / (in_dim + out_dim))
    return jax.random.uniform(
        key, (in_dim, out_dim), dtype=dtype, minval=-bound, maxval=bound
    )


def _reference(x, weight):
    # Same semantics as torch.matmul(x, F.normalize(W, dim=0)).
    norm = jnp.linalg.norm(weight, axis=0, keepdims=True)
    w_n = weight / jnp.maximum(norm, 1e-12)
    return jnp.matmul(x, w_n, precision=jax.lax.Precision.HIGHEST)


if __name__ == "__main__":
    key = jax.random.PRNGKey(0)
    kx1, kw1, kx2, kw2 = jax.random.split(key, 4)

    # Check 1: small shapes from the original demo (single-tile grid after
    # padding 64 -> 128 lanes).
    batch, seq, in_dim, out_dim = 2, 8, 32, 64
    x1 = jax.random.normal(kx1, (batch, seq, in_dim), dtype=jnp.float32)
    w1 = init_norm_linear_weight(kw1, in_dim, out_dim)
    out1 = jax.block_until_ready(norm_linear(x1, w1))
    exp1 = _reference(x1, w1)
    assert out1.shape == (batch, seq, out_dim)
    assert bool(jnp.allclose(out1, exp1, atol=1e-3, rtol=1e-3))

    # Check 2: shapes that exercise the multi-tile (M, N, K) grid with
    # K-axis accumulation and padding (grid = (2, 2, 3)).
    b2, s2, k2, n2 = 2, 130, 1100, 270
    x2 = jax.random.normal(kx2, (b2, s2, k2), dtype=jnp.float32)
    w2 = init_norm_linear_weight(kw2, k2, n2)
    out2 = jax.block_until_ready(norm_linear(x2, w2))
    exp2 = _reference(x2, w2)
    assert out2.shape == (b2, s2, n2)
    assert bool(jnp.allclose(out2, exp2, atol=1e-3, rtol=1e-3))

    print("KERNEL_OK")
</pallas_src>

<mosaic_0001>
module attributes {stable_mosaic.version = 11 : i64} {
  func.func @_normlinear_kernel(%arg0: i32, %arg1: i32, %arg2: i32, %arg3: memref<16x128xf32, #tpu.memory_space<vmem>>, %arg4: memref<128x128xf32, #tpu.memory_space<vmem>>, %arg5: memref<16x128xf32, #tpu.memory_space<vmem>>, %arg6: memref<16x128xf32, #tpu.memory_space<vmem>>, %arg7: memref<1x128xf32, #tpu.memory_space<vmem>>) attributes {dimension_semantics = [#tpu.dimension_semantics<parallel>, #tpu.dimension_semantics<parallel>, #tpu.dimension_semantics<arbitrary>], iteration_bounds = array<i64: 1, 1, 1>, scalar_prefetch = 0 : i64, scratch_operands = 2 : i64, tpu.core_type = #tpu.core_type<tc>, window_params = [{transform_indices = @transform_0, window_bounds = array<i64: 16, 128>}, {transform_indices = @transform_1, window_bounds = array<i64: 128, 128>}, {transform_indices = @transform_2, window_bounds = array<i64: 16, 128>}]} {
    %c0_i32 = arith.constant 0 : i32
    %0 = arith.cmpi eq, %arg2, %c0_i32 : i32
    %1 = arith.extui %0 : i1 to i32
    %c0_i32_0 = arith.constant 0 : i32
    %2 = arith.cmpi ne, %1, %c0_i32_0 : i32
    scf.if %2 {
      %cst_15 = arith.constant 0.000000e+00 : f32
      %18 = vector.broadcast %cst_15 : f32 to vector<16x128xf32>
      %c0_16 = arith.constant 0 : index
      %c0_17 = arith.constant 0 : index
      %19 = vector.load %arg6[%c0_16, %c0_17] : memref<16x128xf32, #tpu.memory_space<vmem>>, vector<16x128xf32>
      tpu.vector_store %arg6[%c0_16, %c0_17], %18 {strides = array<i32>} : memref<16x128xf32, #tpu.memory_space<vmem>>, vector<16x128xf32>,
      %cst_18 = arith.constant 0.000000e+00 : f32
      %20 = vector.broadcast %cst_18 : f32 to vector<1x128xf32>
      %c0_19 = arith.constant 0 : index
      %c0_20 = arith.constant 0 : index
      %21 = vector.load %arg7[%c0_19, %c0_20] : memref<1x128xf32, #tpu.memory_space<vmem>>, vector<1x128xf32>
      tpu.vector_store %arg7[%c0_19, %c0_20], %20 {strides = array<i32>} : memref<1x128xf32, #tpu.memory_space<vmem>>, vector<1x128xf32>,
    } else {
    }
    %c0 = arith.constant 0 : index
    %c0_1 = arith.constant 0 : index
    %3 = vector.load %arg4[%c0, %c0_1] : memref<128x128xf32, #tpu.memory_space<vmem>>, vector<128x128xf32>
    %c0_2 = arith.constant 0 : index
    %c0_3 = arith.constant 0 : index
    %4 = vector.load %arg7[%c0_2, %c0_3] : memref<1x128xf32, #tpu.memory_space<vmem>>, vector<1x128xf32>
    %5 = arith.mulf %3, %3 : vector<128x128xf32>
    %cst = arith.constant dense<0.000000e+00> : vector<128xf32>
    %6 = vector.multi_reduction <add>, %5, %cst [0] : vector<128x128xf32> to vector<128xf32>
    %7 = vector.shape_cast %6 : vector<128xf32> to vector<1x128xf32>
    %8 = arith.addf %4, %7 : vector<1x128xf32>
    %c0_4 = arith.constant 0 : index
    %c0_5 = arith.constant 0 : index
    %9 = vector.load %arg7[%c0_4, %c0_5] : memref<1x128xf32, #tpu.memory_space<vmem>>, vector<1x128xf32>
    tpu.vector_store %arg7[%c0_4, %c0_5], %8 {strides = array<i32>} : memref<1x128xf32, #tpu.memory_space<vmem>>, vector<1x128xf32>,
    %c0_6 = arith.constant 0 : index
    %c0_7 = arith.constant 0 : index
    %10 = vector.load %arg6[%c0_6, %c0_7] : memref<16x128xf32, #tpu.memory_space<vmem>>, vector<16x128xf32>
    %c0_8 = arith.constant 0 : index
    %c0_9 = arith.constant 0 : index
    %11 = vector.load %arg3[%c0_8, %c0_9] : memref<16x128xf32, #tpu.memory_space<vmem>>, vector<16x128xf32>
    %cst_10 = arith.constant dense<0.000000e+00> : vector<16x128xf32>
    %12 = tpu.matmul %11, %3, %cst_10 {dimension_numbers = #tpu.dot_dimension_numbers<[1], [0], [0], [1], [0, 0, 1, 1], [], []>} : vector<16x128xf32>, vector<128x128xf32>, vector<16x128xf32> -> vector<16x128xf32>
    %13 = arith.addf %10, %12 : vector<16x128xf32>
    %c0_11 = arith.constant 0 : index
    %c0_12 = arith.constant 0 : index
    %14 = vector.load %arg6[%c0_11, %c0_12] : memref<16x128xf32, #tpu.memory_space<vmem>>, vector<16x128xf32>
    tpu.vector_store %arg6[%c0_11, %c0_12], %13 {strides = array<i32>} : memref<16x128xf32, #tpu.memory_space<vmem>>, vector<16x128xf32>,
    %c0_i32_13 = arith.constant 0 : i32
    %15 = arith.cmpi eq, %arg2, %c0_i32_13 : i32
    %16 = arith.extui %15 : i1 to i32
    %c0_i32_14 = arith.constant 0 : i32
    %17 = arith.cmpi ne, %16, %c0_i32_14 : i32
    scf.if %17 {
      %c0_15 = arith.constant 0 : index
      %c0_16 = arith.constant 0 : index
      %18 = vector.load %arg7[%c0_15, %c0_16] : memref<1x128xf32, #tpu.memory_space<vmem>>, vector<1x128xf32>
      %cst_17 = arith.constant 1.000000e-24 : f32
      %19 = vector.broadcast %cst_17 : f32 to vector<1x128xf32>
      %20 = arith.maximumf %18, %19 : vector<1x128xf32>
      %21 = math.rsqrt %20 : vector<1x128xf32>
      %c0_18 = arith.constant 0 : index
      %c0_19 = arith.constant 0 : index
      %22 = vector.load %arg6[%c0_18, %c0_19] : memref<16x128xf32, #tpu.memory_space<vmem>>, vector<16x128xf32>
      %23 = vector.broadcast %21 : vector<1x128xf32> to vector<16x128xf32>
      %24 = arith.mulf %22, %23 : vector<16x128xf32>
      %c0_20 = arith.constant 0 : index
      %c0_21 = arith.constant 0 : index
      %25 = vector.load %arg5[%c0_20, %c0_21] : memref<16x128xf32, #tpu.memory_space<vmem>>, vector<16x128xf32>
      tpu.vector_store %arg5[%c0_20, %c0_21], %24 {strides = array<i32>} : memref<16x128xf32, #tpu.memory_space<vmem>>, vector<16x128xf32>,
    } else {
    }
    return
  }
  func.func @transform_0(%arg0: i32, %arg1: i32, %arg2: i32) -> (i32, i32) {
    %c0_i32 = arith.constant 0 : i32
    return %arg0, %arg2 : i32, i32
  }
  func.func @transform_1(%arg0: i32, %arg1: i32, %arg2: i32) -> (i32, i32) {
    %c0_i32 = arith.constant 0 : i32
    return %arg2, %arg1 : i32, i32
  }
  func.func @transform_2(%arg0: i32, %arg1: i32, %arg2: i32) -> (i32, i32) {
    %c0_i32 = arith.constant 0 : i32
    return %arg0, %arg1 : i32, i32
  }
}

</mosaic_0001>

<bundles_post_ra>
// kernel: norm_linear.1
= control target key start
LH: loop header
LB: loop body
LE: loop exit
PB: predicated region body
PF: predicated region fallthrough
CT: control target
= control target key end

     0   :  { %v152_v2 = vmov 0.0   ;;  %s252_s1 = inlined_call_operand.vmem [shape: f32[128,128], index: 1, kind: input, shape index: {}]   ;;  %s253_s0 = inlined_call_operand.vmem [shape: f32[16,128], index: 0, kind: input, shape index: {}]   ;;  %s254_s2 = inlined_call_operand.vmem [shape: f32[16,128], index: 2, kind: output, shape index: {}]  }
   0x1   :  { %v171_v0 = vld [vmem:[%s252_s1 + $0x78] sm:$0xff]  ;;  %v176_v1 = vld [vmem:[%s252_s1 + $0x70] sm:$0xff]  ;;  %17 = vst [vmem:[#allocation3] sm:$0x1] %v152_v2  ;;  %v31_v3 = vld [vmem:[%s252_s1 + $0x68] sm:$0xff] }
   0x2   :  { %78 = vmatpush.msra.mxu0 %v171_v0  ;;  %133 = vmatpush.msra.mxu1 %v171_v0  ;;  %v30_v4 = vld [vmem:[%s252_s1 + $0x60] sm:$0xff]  ;;  %v196_v6 = vld [vmem:[%s252_s1 + $0x8] sm:$0xff]  ;;  %v20_v7 = vld [vmem:[%s252_s1 + $0x10] sm:$0xff]  ;;  %v48_v40 = vmul.f32 %v31_v3, %v31_v3  ;;  %v49_v42 = vmul.f32 %v176_v1, %v176_v1  ;;  %v50_v46 = vmul.f32 %v171_v0, %v171_v0 }
   0x3   :  { %v191_v5 = vld [vmem:[%s252_s1] sm:$0xff]  ;;  %v36_v9 = vmul.f32 %v196_v6, %v196_v6  ;;  %v29_v10 = vld [vmem:[%s252_s1 + $0x58] sm:$0xff]  ;;  %v37_v12 = vmul.f32 %v20_v7, %v20_v7  ;;  %v28_v15 = vld [vmem:[%s252_s1 + $0x50] sm:$0xff]  ;;  %v47_v38 = vmul.f32 %v30_v4, %v30_v4 }
   0x4   :  { %79 = vmatpush.msra.mxu0 %v176_v1  ;;  %134 = vmatpush.msra.mxu1 %v176_v1  ;;  %v35_v8 = vmul.f32 %v191_v5, %v191_v5  ;;  %v21_v11 = vld [vmem:[%s252_s1 + $0x18] sm:$0xff]  ;;  %v22_v16 = vld [vmem:[%s252_s1 + $0x20] sm:$0xff]  ;;  %v27_v19 = vld [vmem:[%s252_s1 + $0x48] sm:$0xff]  ;;  %v45_v34 = vmul.f32 %v28_v15, %v28_v15  ;;  %v46_v36 = vmul.f32 %v29_v10, %v29_v10 }
   0x5   :  { %v38_v13 = vmul.f32 %v21_v11, %v21_v11  ;;  %v39_v17 = vmul.f32 %v22_v16, %v22_v16  ;;  %v23_v20 = vld [vmem:[%s252_s1 + $0x28] sm:$0xff]  ;;  %v26_v23 = vld [vmem:[%s252_s1 + $0x40] sm:$0xff]  ;;  %v24_v24 = vld [vmem:[%s252_s1 + $0x30] sm:$0xff]  ;;  %v44_v32 = vmul.f32 %v27_v19, %v27_v19 }
   0x6   :  { %80 = vmatpush.msra.mxu0 %v31_v3  ;;  %135 = vmatpush.msra.mxu1 %v31_v3  ;;  %v51_v14 = vadd.f32 %v36_v9, %v35_v8  ;;  %v40_v21 = vmul.f32 %v23_v20, %v23_v20  ;;  %v41_v25 = vmul.f32 %v24_v24, %v24_v24  ;;  %v25_v27 = vld [vmem:[%s252_s1 + $0x38] sm:$0xff]  ;;  %v76_v44 = vld [vmem:[%s253_s0] sm:$0xff]  ;;  %v77_v45 = vld [vmem:[%s253_s0 + $0x8] sm:$0xff] }
   0x7   :  { %v42_v28 = vmul.f32 %v25_v27, %v25_v27  ;;  %v43_v30 = vmul.f32 %v26_v23, %v26_v23 }
   0x8   :  { %81 = vmatpush.msra.mxu0 %v30_v4  ;;  %136 = vmatpush.msra.mxu1 %v30_v4  ;;  %v52_v18 = vadd.f32 %v51_v14, %v37_v12  ;;  %v34_v55 = vld [vmem:[#allocation3] sm:$0x1] }
   0xa   :  { %82 = vmatpush.msra.mxu0 %v29_v10  ;;  %137 = vmatpush.msra.mxu1 %v29_v10  ;;  %v53_v22 = vadd.f32 %v52_v18, %v38_v13 }
   0xc   :  { %83 = vmatpush.msra.mxu0 %v28_v15  ;;  %138 = vmatpush.msra.mxu1 %v28_v15  ;;  %v54_v26 = vadd.f32 %v53_v22, %v39_v17 }
   0xe   :  { %84 = vmatpush.msra.mxu0 %v27_v19  ;;  %139 = vmatpush.msra.mxu1 %v27_v19  ;;  %v55_v29 = vadd.f32 %v54_v26, %v40_v21 }
  0x10   :  { %85 = vmatpush.msra.mxu0 %v26_v23  ;;  %140 = vmatpush.msra.mxu1 %v26_v23  ;;  %v56_v31 = vadd.f32 %v55_v29, %v41_v25 }
  0x12   :  { %86 = vmatpush.msra.mxu0 %v25_v27  ;;  %141 = vmatpush.msra.mxu1 %v25_v27  ;;  %v57_v33 = vadd.f32 %v56_v31, %v42_v28 }
  0x14   :  { %87 = vmatpush.msra.mxu0 %v24_v24  ;;  %142 = vmatpush.msra.mxu1 %v24_v24  ;;  %v58_v35 = vadd.f32 %v57_v33, %v43_v30 }
  0x16   :  { %88 = vmatpush.msra.mxu0 %v23_v20  ;;  %143 = vmatpush.msra.mxu1 %v23_v20  ;;  %v59_v37 = vadd.f32 %v58_v35, %v44_v32 }
  0x18   :  { %89 = vmatpush.msra.mxu0 %v22_v16  ;;  %144 = vmatpush.msra.mxu1 %v22_v16  ;;  %v60_v39 = vadd.f32 %v59_v37, %v45_v34 }
  0x1a   :  { %90 = vmatpush.msra.mxu0 %v21_v11  ;;  %145 = vmatpush.msra.mxu1 %v21_v11  ;;  %v61_v41 = vadd.f32 %v60_v39, %v46_v36 }
  0x1c   :  { %91 = vmatpush.msra.mxu0 %v20_v7  ;;  %146 = vmatpush.msra.mxu1 %v20_v7  ;;  %v62_v43 = vadd.f32 %v61_v41, %v47_v38 }
  0x1e   :  { %92 = vmatpush.msra.mxu0 %v196_v6  ;;  %147 = vmatpush.msra.mxu1 %v196_v6  ;;  %v63_v47 = vadd.f32 %v62_v43, %v48_v40 }
  0x20   :  { %93 = vmatpush.msra.mxu0 %v191_v5  ;;  %148 = vmatpush.msra.mxu1 %v191_v5  ;;  %v64_v48 = vadd.f32 %v63_v47, %v49_v42 }
  0x21   :  { %94 = vmatmul.f32.vlgmr.msra.gmra.mxu0 %v76_v44  ;;  %97 = vmatmul.f32.vlgmr.msra.gmra.mxu1 %v77_v45 }
  0x22   :  { %v65_v49 = vadd.f32 %v64_v48, %v50_v46 }
  0x24   :  { %v66_v50 = vrot.slane %v65_v49, 4 }
  0x26   :  { %v67_v51 = vadd.f32 %v66_v50, %v65_v49 }
  0x28   :  { %v68_v52 = vrot.slane %v67_v51, 2 }
  0x2a   :  { %v69_v53 = vadd.f32 %v68_v52, %v67_v51 }
  0x2c   :  { %v70_v54 = vrot.slane %v69_v53, 1 }
  0x2e   :  { %v71_v56 = vadd.f32 %v70_v54, %v69_v53 }
  0x30   :  { %v72_v57 = vadd.f32 %v71_v56, %v34_v55 }
  0x32   :  { %73 = vst [vmem:[#allocation3] sm:$0x1] %v72_v57 }
  0x39   :  { %v108_v58 = vld [vmem:[#allocation3] sm:$0x1] }
  0x3a   :  { %v109_v59 = vmax.f32 %v108_v58, 1e-24 }
  0x3c   :  { %150 = vrsqrt.f32 %v109_v59  ;;  %vm116_vm0 = vweird.f32 %v109_v59 }
  0x42   :  { %v151_v60 = vpop.eup %150 }
  0x43   :  { %v111_v61 = vmul.f32 %v151_v60, %v109_v59  ;;  %vm117_vm1 = vweird.f32 %v151_v60 }
  0x44   :  { %vm118_vm2 = vmor %vm116_vm0, %vm117_vm1 }
  0x45   :  { %v112_v62 = vmul.f32 %v151_v60, %v111_v61 }
  0x47   :  { %v113_v63 = vmul.f32 0.5, %v112_v62 }
  0x49   :  { %v114_v0 = vsub.f32 1.5, %v113_v63 }
  0x4b   :  { %v115_v1 = vmul.f32 %v151_v60, %v114_v0 }
  0x4d   :  { %v119_v2 = vsel %vm118_vm2, %v151_v60, %v115_v1 }
  0x4e   :  { %v123_v3 = vperm.slane %v119_v2, 0 }
  0x9e   :  { %v95_v4 = vpop.f32.mrf.mxu0  ;;  %v98_v5 = vpop.f32.mrf.mxu1 }
  0x9f   :  { %v125_v6 = vmul.f32 %v123_v3, %v95_v4  ;;  %v126_v7 = vmul.f32 %v123_v3, %v98_v5 }
  0xa1   :  { %127 = vst [vmem:[%s254_s2] sm:$0xff] %v125_v6 }
  0xa2   :  { %128 = vst [vmem:[%s254_s2 + $0x8] sm:$0xff] %v126_v7 }

</bundles_post_ra>
